<compile_context>
chip_gen: v7x
topology: tpu7x:2x2x1
jax: 0.10.0
libtpu: 0.0.40
codegen_flags: <defaults>
</compile_context>

<pallas_src>
import functools

import jax
import jax.numpy as jnp
from jax.experimental import pallas as pl
from jax.experimental.pallas import tpu as pltpu


def _round_up(x, m):
    return ((x + m - 1) // m) * m


def _smearing_kernel(coeff, exp_dtype, a_ref, b_ref, o_ref):
    # a_ref - b_ref broadcasts to the output block shape:
    #   default (N, G) layout:    a=(tile, 1) distances, b=(1, G)    offsets -> (tile, G)
    #   transposed (G, N) layout: a=(G, 1)    offsets,   b=(1, tile) dists   -> (G, tile)
    # (d - off)^2 == (off - d)^2, so operand order is irrelevant.
    diff = a_ref[...] - b_ref[...]
    arg = (coeff * diff) * diff
    o_ref[...] = jnp.exp(arg.astype(exp_dtype)).astype(o_ref.dtype)


def gaussian_smearing(dist, offset, coeff, *, out_dtype=jnp.float32,
                      transposed_output=False, tile_n=None,
                      exp_dtype=jnp.float32,
                      vmem_budget_bytes=12 * 1024 * 1024):
    """Gaussian basis expansion.

    Returns (N, G) in out_dtype (module semantics) by default, or (G, N) when
    transposed_output=True (lane-dense fast path for consumers that accept it).
    """
    d_flat = jnp.reshape(dist, (-1,)).astype(jnp.float32)
    n = d_flat.shape[0]
    g = offset.shape[0]
    off_f32 = offset.astype(jnp.float32)

    itemsize = jnp.dtype(out_dtype).itemsize
    sub_granule = max(8, 32 // itemsize)  # sublane packing granule of out_dtype

    kernel = functools.partial(_smearing_kernel, float(coeff), exp_dtype)
    params = pltpu.CompilerParams(dimension_semantics=("parallel",))

    if not transposed_output:
        # ----- module-default (N, G) layout ------------------------------------
        # Per-buffer VMEM bytes per row (lane-padded): input (tile,1) f32 -> 512 B,
        # output (tile,G) -> round_up(G,128)*itemsize B.  Both double-buffered.
        per_row = 512 + _round_up(g, 128) * itemsize
        max_tile = max(sub_granule,
                       (vmem_budget_bytes // (2 * per_row))
                       // sub_granule * sub_granule)
        tile = tile_n if tile_n is not None else 4096
        tile = min(tile, max_tile, _round_up(n, sub_granule))
        if pl.cdiv(n, tile) < 2 and n > sub_granule:  # >=2 steps for v7x megacore
            tile = _round_up(pl.cdiv(n, 2), sub_granule)
        tile = max(sub_granule, _round_up(tile, sub_granule))
        num_tiles = pl.cdiv(n, tile)

        n_pad = num_tiles * tile
        if n_pad != n:
            d_flat = jnp.pad(d_flat, (0, n_pad - n))

        return pl.pallas_call(
            kernel,
            out_shape=jax.ShapeDtypeStruct((n, g), out_dtype),
            grid=(num_tiles,),
            in_specs=[
                pl.BlockSpec((tile, 1), lambda i: (i, 0)),
                pl.BlockSpec((1, g), lambda i: (0, 0)),   # constant -> single DMA
            ],
            out_specs=pl.BlockSpec((tile, g), lambda i: (i, 0)),
            compiler_params=params,
        )(d_flat.reshape(n_pad, 1), off_f32.reshape(1, g))

    # ----- lane-dense transposed (G, N) layout ----------------------------------
    # Per-buffer VMEM bytes per output column: input (1,tile) f32 -> 32 B,
    # output (G,tile) -> round_up(G, sublane granule)*itemsize B.  Double-buffered.
    per_col = 32 + _round_up(g, sub_granule) * itemsize
    max_tile = max(128, (vmem_budget_bytes // (2 * per_col)) // 128 * 128)
    tile = tile_n if tile_n is not None else 8192
    tile = min(tile, max_tile, _round_up(n, 128))
    if pl.cdiv(n, tile) < 2 and n > 128:              # >=2 steps for v7x megacore
        tile = _round_up(pl.cdiv(n, 2), 128)
    tile = max(128, _round_up(tile, 128))
    num_tiles = pl.cdiv(n, tile)

    n_pad = num_tiles * tile
    if n_pad != n:
        d_flat = jnp.pad(d_flat, (0, n_pad - n))

    return pl.pallas_call(
        kernel,
        out_shape=jax.ShapeDtypeStruct((g, n), out_dtype),
        grid=(num_tiles,),
        in_specs=[
            pl.BlockSpec((g, 1), lambda i: (0, 0)),       # constant -> single DMA
            pl.BlockSpec((1, tile), lambda i: (0, i)),
        ],
        out_specs=pl.BlockSpec((g, tile), lambda i: (0, i)),
        compiler_params=params,
    )(off_f32.reshape(g, 1), d_flat.reshape(1, n_pad))


def make_gaussian_smearing_params(start=-5.0, stop=5.0, num_gaussians=50,
                                  basis_width_scalar=1.0):
    """Deterministic parameter setup mirroring GaussianSmearing.__init__."""
    offset = jnp.linspace(start, stop, num_gaussians, dtype=jnp.float32)
    step = (stop - start) / (num_gaussians - 1)
    coeff = -0.5 / (basis_width_scalar * step) ** 2
    return offset, coeff


if __name__ == "__main__":
    key = jax.random.PRNGKey(0)
    k1, k2 = jax.random.split(key)

    offset, coeff = make_gaussian_smearing_params(
        start=-5.0, stop=5.0, num_gaussians=50, basis_width_scalar=1.0)

    def reference(d):
        dd = d.reshape(-1, 1) - offset.reshape(1, -1)
        return jnp.exp(coeff * dd * dd)

    # 1) Module-default (N, G) layout, ragged N=100: exercises the >=2-step clamp
    #    (two 56-row tiles) and the masked ragged-tail store.
    dist1 = jax.random.uniform(k1, (100,), dtype=jnp.float32, minval=0.0, maxval=5.0)
    out1 = jax.block_until_ready(gaussian_smearing(dist1, offset, coeff))
    ref1 = reference(dist1)
    assert out1.shape == (100, 50), out1.shape
    assert jnp.allclose(out1, ref1, atol=1e-5, rtol=1e-5)

    # 2) Lane-dense transposed (G, N) fast path, 2-D input (2,128) -> N=256,
    #    two 128-lane tiles across the parallel axis, unmasked full-lane stores.
    dist2 = jax.random.uniform(k2, (2, 128), dtype=jnp.float32, minval=0.0, maxval=5.0)
    out2 = jax.block_until_ready(
        gaussian_smearing(dist2, offset, coeff, transposed_output=True))
    ref2 = reference(dist2).T
    assert out2.shape == (50, 256), out2.shape
    assert jnp.allclose(out2, ref2, atol=1e-5, rtol=1e-5)

    # 3) bf16 output path (recommended for HBM-write-bound v5e/v6e consumers);
    #    also exercises the 16-row sublane-granule tile rounding.
    out3 = jax.block_until_ready(
        gaussian_smearing(dist1, offset, coeff, out_dtype=jnp.bfloat16))
    assert out3.shape == (100, 50), out3.shape
    assert jnp.allclose(out3.astype(jnp.float32), ref1, atol=2e-2, rtol=2e-2)

    print("KERNEL_OK")
</pallas_src>

<mosaic_0001>
module attributes {stable_mosaic.version = 11 : i64} {
  func.func @_smearing_kernel(%arg0: i32, %arg1: memref<56x1xf32, #tpu.memory_space<vmem>>, %arg2: memref<1x50xf32, #tpu.memory_space<vmem>>, %arg3: memref<56x50xf32, #tpu.memory_space<vmem>>) attributes {dimension_semantics = [#tpu.dimension_semantics<parallel>], iteration_bounds = array<i64: 2>, scalar_prefetch = 0 : i64, scratch_operands = 0 : i64, tpu.core_type = #tpu.core_type<tc>, window_params = [{transform_indices = @transform_0, window_bounds = array<i64: 56, 1>}, {pipeline_mode = #tpu.pipeline_mode<synchronous>, transform_indices = @transform_1, window_bounds = array<i64: 1, 50>}, {transform_indices = @transform_2, window_bounds = array<i64: 56, 50>}]} {
    %c0 = arith.constant 0 : index
    %c0_0 = arith.constant 0 : index
    %0 = vector.load %arg1[%c0, %c0_0] : memref<56x1xf32, #tpu.memory_space<vmem>>, vector<56x1xf32>
    %c0_1 = arith.constant 0 : index
    %c0_2 = arith.constant 0 : index
    %1 = vector.load %arg2[%c0_1, %c0_2] : memref<1x50xf32, #tpu.memory_space<vmem>>, vector<1x50xf32>
    %2 = vector.broadcast %0 : vector<56x1xf32> to vector<56x50xf32>
    %3 = vector.broadcast %1 : vector<1x50xf32> to vector<56x50xf32>
    %4 = arith.subf %2, %3 : vector<56x50xf32>
    %cst = arith.constant -1.200500e+01 : f32
    %5 = vector.broadcast %cst : f32 to vector<56x50xf32>
    %6 = arith.mulf %5, %4 : vector<56x50xf32>
    %7 = arith.mulf %6, %4 : vector<56x50xf32>
    %8 = math.exp %7 : vector<56x50xf32>
    %c0_3 = arith.constant 0 : index
    %c0_4 = arith.constant 0 : index
    %9 = vector.load %arg3[%c0_3, %c0_4] : memref<56x50xf32, #tpu.memory_space<vmem>>, vector<56x50xf32>
    tpu.vector_store %arg3[%c0_3, %c0_4], %8 {strides = array<i32>} : memref<56x50xf32, #tpu.memory_space<vmem>>, vector<56x50xf32>,
    return
  }
  func.func @transform_0(%arg0: i32) -> (i32, i32) {
    %c0_i32 = arith.constant 0 : i32
    %c0_i32_0 = arith.constant 0 : i32
    return %arg0, %c0_i32 : i32, i32
  }
  func.func @transform_1(%arg0: i32) -> (i32, i32) {
    %c0_i32 = arith.constant 0 : i32
    %c0_i32_0 = arith.constant 0 : i32
    %c0_i32_1 = arith.constant 0 : i32
    return %c0_i32, %c0_i32_0 : i32, i32
  }
  func.func @transform_2(%arg0: i32) -> (i32, i32) {
    %c0_i32 = arith.constant 0 : i32
    %c0_i32_0 = arith.constant 0 : i32
    return %arg0, %c0_i32 : i32, i32
  }
}

</mosaic_0001>

<bundles_post_ra>
// kernel: tpu_custom_call.1
= control target key start
LH: loop header
LB: loop body
LE: loop exit
PB: predicated region body
PF: predicated region fallthrough
CT: control target
= control target key end

     0   :  { %s712_s9 = smov 0   ;;  %s714_s10 = smov 0   ;;  %s825_s0 = inlined_call_operand.vmem [shape: f32[112,1], index: 0, kind: input, shape index: {}]   ;;  %s826_s1 = inlined_call_operand.vmem [shape: f32[1,50], index: 1, kind: input, shape index: {}]   ;;  %s827_s2 = inlined_call_operand.vmem [shape: f32[100,50], index: 2, kind: output, shape index: {}]  }
   0x1   :  { %s716_s11 = smov 0  }
   0x2 LB: > { %s725_s12 = sadd.s32 4294967295, %s662_s11   ;;  %s727_s13 = sadd.s32 1, %s662_s11   ;;  %s662_s11 = sphi %s716_s11, %s834_s11   ;;  %s658_s10 = sphi %s714_s10, %s833_s10   ;;  %s654_s9 = sphi %s712_s9, %s832_s9  }
   0x3   : > { %s63_s14 = ssub.s32 %s662_s11, %s727_s13  ;;  %s66_s15 = sadd.s32 1, %s658_s10 }
   0x4   : > { %p64_p0 = scmp.eq.s32.totalorder %s63_s14, 0  ;;  %p76_p1 = scmp.ne.s32.totalorder %s658_s10, %s654_s9 }
   0x5   : > { %p77_p2 = scmp.eq.s32.totalorder %s725_s12, 1  ;;  %p481_p3 = scmp.ge.s32.totalorder %s662_s11, 1 }
   0x6   : > { %s735_s16 = scalar_select %p64_p0, %s658_s10, %s66_s15  }
   0x7   : > { %p737_p4 = por %p77_p2, %p76_p1  ;;  %p113_p5 = scmp.lt.s32.totalorder %s662_s11, 3 }
   0x9   : > { %p114_p6 = pnand %p481_p3, %p113_p5 }
   0xa   : > { %s742_s18 = smul.u32 (!%p114_p6), 7, %s725_s12  ;;  %v696_v0 = vmov (!%p114_p6), 0   ;;  %v483_v8 = vld [vmem:[%s826_s1] ss:$0 sm:$0xff] (!%p114_p6)  ;;  %s131_s26 = sand.u32 (!%p114_p6), 1, %s654_s9   ;;  %vm229_vm0 = vcmask (!%p114_p6), 408576  }
   0xb   : > { %117 = sbr.rel (%p114_p6) target bundleno = 244 (0xf4), region = 28  ;;  %589 = vset.pattern.permute.xlu1 (!%p114_p6), %v696_v0  ;;  %588 = vset.pattern.permute.xlu0 (!%p114_p6), %v696_v0 }
   0xc   : > { %p135_p7 = scmp.lt.s32.totalorder (!%p114_p6), %s742_s18, 13  ;;  %s497_s27 = smul.u32 (!%p114_p6), 56, %s131_s26 }
   0xe   : > { %s753_s28 = scalar_lea.vmem (!%p114_p6), [#allocation2], %s497_s27  }
  0x12   : > { %s136_s19 = scalar_select %p135_p7, %s742_s18, 13 }
  0x13   : > { %s245_s29 = ssub.s32 (%p737_p4), 13, %s742_s18  ;;  %s496_s30 = smul.u32 (%p737_p4), 56, %s725_s12 }
  0x14   : > { %s482_s20 = sshll.u32 %s136_s19, 3  ;;  %p246_p8 = scmp.lt.s32.totalorder (%p737_p4), %s245_s29, 7 }
  0x15   : > { %s138_s23 = scalar_lea.vmem %s825_s0, %s482_s20  ;;  %s776_s5 = scalar_lea.vmem (%p737_p4), %s827_s2, %s496_s30  }
  0x16   : > { %v147_v1 = vld [vmem:[%s138_s23 + $0x10] sm:$0xff]  ;;  %v145_v2 = vld [vmem:[%s138_s23] sm:$0xff]  ;;  %v148_v3 = vld [vmem:[%s138_s23 + $0x18] sm:$0xff] }
  0x17   : > { %165 = vperm.xlu1 %589, %v147_v1   ;;  %155 = vperm.xlu0 %588, %v145_v2   ;;  %v146_v4 = vld [vmem:[%s138_s23 + $0x8] sm:$0xff]  ;;  %v149_v6 = vld [vmem:[%s138_s23 + $0x20] sm:$0xff]  ;;  %v151_v7 = vld [vmem:[%s138_s23 + $0x30] sm:$0xff] }
  0x18   : > { %v150_v5 = vld [vmem:[%s138_s23 + $0x28] sm:$0xff] }
  0x1b   : > { %170 = vperm.xlu1 %589, %v148_v3   ;;  %160 = vperm.xlu0 %588, %v146_v4  }
  0x1f   : > { %180 = vperm.xlu1 %589, %v150_v5   ;;  %175 = vperm.xlu0 %588, %v149_v6  }
  0x23   : > { %185 = vperm.xlu0 %588, %v151_v7  }
  0x96   : > { %v166_v9 = vpop.permute.xlu1 %165  ;;  %v156_v10 = vpop.permute.xlu0 %155 }
  0x97   : > { %v196_v11 = vsub.f32 %v166_v9, %v483_v8  ;;  %v194_v12 = vsub.f32 %v156_v10, %v483_v8 }
  0x99   : > { %v203_v13 = vmul.f32 -12.005, %v196_v11  ;;  %v201_v14 = vmul.f32 -12.005, %v194_v12 }
  0x9a   : > { %v171_v15 = vpop.permute.xlu1 %170  ;;  %v161_v16 = vpop.permute.xlu0 %160 }
  0x9b   : > { %v210_v17 = vmul.f32 %v203_v13, %v196_v11  ;;  %v208_v18 = vmul.f32 %v201_v14, %v194_v12  ;;  %v197_v19 = vsub.f32 %v171_v15, %v483_v8  ;;  %v195_v20 = vsub.f32 %v161_v16, %v483_v8 }
  0x9d   : > { %v219_v21 = vmul.f32 1.442695, %v210_v17  ;;  %v215_v22 = vmul.f32 1.442695, %v208_v18  ;;  %v204_v23 = vmul.f32 -12.005, %v197_v19 }
  0x9e   : > { %v202_v24 = vmul.f32 -12.005, %v195_v20  ;;  %v181_v25 = vpop.permute.xlu1 %180  ;;  %v176_v26 = vpop.permute.xlu0 %175 }
  0x9f   : > { %590 = vpow2.f32 %v219_v21  ;;  %v211_v27 = vmul.f32 %v204_v23, %v197_v19  ;;  %v199_v28 = vsub.f32 %v181_v25, %v483_v8  ;;  %v198_v29 = vsub.f32 %v176_v26, %v483_v8 }
  0xa0   : > { %592 = vpow2.f32 %v215_v22  ;;  %v209_v30 = vmul.f32 %v202_v24, %v195_v20 }
  0xa1   : > { %v221_v31 = vmul.f32 1.442695, %v211_v27  ;;  %v206_v32 = vmul.f32 -12.005, %v199_v28  ;;  %v205_v33 = vmul.f32 -12.005, %v198_v29 }
  0xa2   : > { %v217_v34 = vmul.f32 1.442695, %v209_v30  ;;  %v186_v35 = vpop.permute.xlu0 %185 }
  0xa3   : > { %594 = vpow2.f32 %v221_v31  ;;  %v213_v36 = vmul.f32 %v206_v32, %v199_v28  ;;  %v212_v37 = vmul.f32 %v205_v33, %v198_v29  ;;  %v200_v38 = vsub.f32 %v186_v35, %v483_v8 }
  0xa4   : > { %596 = vpow2.f32 %v217_v34 }
  0xa5   : > { %v225_v39 = vmul.f32 1.442695, %v213_v36  ;;  %v223_v40 = vmul.f32 1.442695, %v212_v37  ;;  %v207_v41 = vmul.f32 -12.005, %v200_v38 }
  0xa7   : > { %598 = vpow2.f32 %v225_v39  ;;  %v214_v42 = vmul.f32 %v207_v41, %v200_v38 }
  0xa8   : > { %600 = vpow2.f32 %v223_v40 }
  0xa9   : > { %v591_v43 = vpop.eup %590  ;;  %v227_v44 = vmul.f32 1.442695, %v214_v42 }
  0xaa   : > { %v593_v45 = vpop.eup %592  ;;  %232 = vst.msk [vmem:[%s753_s28 + $0x10] sm:$0xff] %vm229_vm0, %v591_v43 }
  0xab   : > { %230 = vst.msk [vmem:[%s753_s28] sm:$0xff] %vm229_vm0, %v593_v45  ;;  %602 = vpow2.f32 %v227_v44 }
  0xad   : > { %v595_v46 = vpop.eup %594 }
  0xae   : > { %v597_v47 = vpop.eup %596  ;;  %233 = vst.msk [vmem:[%s753_s28 + $0x18] sm:$0xff] %vm229_vm0, %v595_v46 }
  0xaf   : > { %231 = vst.msk [vmem:[%s753_s28 + $0x8] sm:$0xff] %vm229_vm0, %v597_v47 }
  0xb0   : > { %243 = sbr.rel (!%p737_p4) target bundleno = 244 (0xf4), region = 32 }
  0xb1   : > { %v599_v48 = vpop.eup %598 }
  0xb2   : > { %v601_v49 = vpop.eup %600  ;;  %235 = vst.msk [vmem:[%s753_s28 + $0x28] sm:$0xff] %vm229_vm0, %v599_v48 }
  0xb3   : > { %234 = vst.msk [vmem:[%s753_s28 + $0x20] sm:$0xff] %vm229_vm0, %v601_v49 }
  0xb5   : > { %v603_v50 = vpop.eup %602 }
  0xb6   : > { %236 = vst.msk [vmem:[%s753_s28 + $0x30] sm:$0xff] %vm229_vm0, %v603_v50 }
  0xb7   : > { %s836_s29 = smov (!%p246_p8, %s245_s29), 7 }
  0xb8   : > { %s484_s6 = sshll.u32 %s836_s29, 7 }
  0xb9   : > { %p487_p9 = scmp.eq.s32.totalorder %s484_s6, 0 }
  0xba   : > { %604 = sdivrem.u32 (!%p487_p9), %s836_s29, 7 }
  0xbb   : > { %254 = sbr.rel (%p487_p9) target bundleno = 244 (0xf4), region = 36 }
  0xc3   : > { %s782_s7 = spop.drf %604 }
  0xc4   : > { %p488_p10 = scmp.le.s32.totalorder %s782_s7, 0 }
  0xc5   : > { %s829_s8 = smov (!%p488_p10), %s776_s5  ;;  %s830_s9 = smov (!%p488_p10), %s753_s28 }
  0xc6   : > { %434 = sbr.rel (%p488_p10) target bundleno = 215 (0xd7), region = 112  ;;  %s791_s11 = smov (!%p488_p10), 0  }
  0xc7   : > { %s793_s12 = smov (!%p488_p10), 0  }
  0xcd LB: >> { %v330_v51 = vld [vmem:[%s670_s9] sm:$0xff]  ;;  %v332_v52 = vld [vmem:[%s670_s9 + $0x8] sm:$0xff]  ;;  %v334_v53 = vld [vmem:[%s670_s9 + $0x10] sm:$0xff]  ;;  %s344_s14 = sadd.s32 1, %s674_s11  ;;  %s324_s12 = sadd.s32 1, %s678_s12   ;;  %s678_s12 = sphi %s793_s12, %s324_s12   ;;  %s674_s11 = sphi %s791_s11, %s831_s11   ;;  %s670_s9 = sphi %s830_s9, %s349_s9   ;;  %s666_s8 = sphi %s829_s8, %s350_s8  }
  0xce   : >> { %331 = vst [vmem:[%s666_s8] sm:$0xff] %v330_v51  ;;  %333 = vst [vmem:[%s666_s8 + $0x8] sm:$0xff] %v332_v52  ;;  %v336_v54 = vld [vmem:[%s670_s9 + $0x18] sm:$0xff]  ;;  %v338_v55 = vld [vmem:[%s670_s9 + $0x20] sm:$0xff]  ;;  %p345_p11 = scmp.ge.s32.totalorder %s344_s14, %s782_s7  ;;  %p323_p12 = scmp.ge.s32.totalorder %s324_s12, %s782_s7 }
  0xcf   : >> { %335 = vst [vmem:[%s666_s8 + $0x10] sm:$0xff] %v334_v53  ;;  %v340_v56 = vld [vmem:[%s670_s9 + $0x28] sm:$0xff]  ;;  %337 = vst [vmem:[%s666_s8 + $0x18] sm:$0xff] %v336_v54  ;;  %v342_v57 = vld [vmem:[%s670_s9 + $0x30] sm:$0xff] }
  0xd0   : >> { %339 = vst [vmem:[%s666_s8 + $0x20] sm:$0xff] %v338_v55  ;;  %341 = vst [vmem:[%s666_s8 + $0x28] sm:$0xff] %v340_v56  ;;  %s838_s14 = smov (%p345_p11, %s344_s14), 0  ;;  %326 = sbr.rel (!%p323_p12) target bundleno = 205 (0xcd), region = 118 }
  0xd1   : >> { %343 = vst [vmem:[%s666_s8 + $0x30] sm:$0xff] %v342_v57  ;;  %s347_s15 = smul.u32 56, %s838_s14  ;;  %s831_s11 = smov %s838_s14 }
  0xd3   : >> { %s349_s9 = scalar_lea.vmem %s753_s28, %s347_s15 [#allocation2]   ;;  %s350_s8 = scalar_lea.vmem %s776_s5, %s347_s15  }
  0xd7 PF: > { %606 = sdivrem.u32 %s836_s29, 7 }
  0xd8   : > { %s489_s17 = smul.u32 56, %s782_s7 }
  0xda   : > { %s355_s18 = scalar_lea.vmem %s753_s28, %s489_s17 [#allocation2]   ;;  %s357_s19 = scalar_lea.vmem %s776_s5, %s489_s17  }
  0xe0   : > { %s607_s20 = spop.drf %606 }
  0xe1   : > { %p491_p13 = scmp.le.s32.totalorder %s607_s20, 0 }
  0xe2   : > { %s680_s21 = smov (!%p491_p13), %s357_s19   ;;  %s684_s22 = smov (!%p491_p13), %s355_s18  }
  0xe3   : > { %448 = sbr.rel (%p491_p13) target bundleno = 244 (0xf4), region = 123  ;;  %s688_s23 = smov (!%p491_p13), 0  }
  0xe4   : > { %s692_s24 = smov (!%p491_p13), 0  }
  0xea LB: >> { %v367_v58 = vld [vmem:[%s686_s22] sm:$0xff]  ;;  %s369_s25 = sadd.s32 1, %s690_s23  ;;  %s361_s24 = sadd.s32 1, %s694_s24   ;;  %s694_s24 = sphi %s692_s24, %s361_s24   ;;  %s690_s23 = sphi %s688_s23, %s689_s23   ;;  %s686_s22 = sphi %s684_s22, %s374_s22   ;;  %s682_s21 = sphi %s680_s21, %s375_s21  }
  0xeb   : >> { %368 = vst [vmem:[%s682_s21] sm:$0xff] %v367_v58  ;;  %p370_p0 = scmp.ge.s32.totalorder %s369_s25, %s607_s20  ;;  %p360_p1 = scmp.ge.s32.totalorder %s361_s24, %s607_s20 }
  0xed   : >> { %s840_s25 = smov (%p370_p0, %s369_s25), 0  ;;  %363 = sbr.rel (!%p360_p1) target bundleno = 234 (0xea), region = 129 }
  0xee   : >> { %s492_s26 = sshll.u32 %s840_s25, 3  ;;  %s689_s23 = smov %s840_s25  }
  0xef   : >> { %s374_s22 = scalar_lea.vmem %s355_s18, %s492_s26 [#allocation2]   ;;  %s375_s21 = scalar_lea.vmem %s357_s19, %s492_s26  }
  0xf4 PF: > { %p9_p2 = scmp.ge.s32.totalorder %s727_s13, 4   ;;  %s832_s9 = smov %s658_s10 }
  0xf5   : > { %s833_s10 = smov %s735_s16  ;;  %s834_s11 = smov %s727_s13 }
  0xf6   :  { %11 = sbr.rel (!%p9_p2) target bundleno = 2 (0x2), region = 140 }

</bundles_post_ra>
